<compile_context>
chip_gen: v7x
topology: tpu7x:2x2x1
jax: 0.10.0
libtpu: 0.0.40
codegen_flags: <defaults>
</compile_context>

<pallas_src>
import math

import numpy as np
import jax
import jax.numpy as jnp
from jax import lax
from jax.experimental import pallas as pl
from jax.experimental.pallas import tpu as pltpu

_MiB = 1024 * 1024


# ---------------------------------------------------------------------------
# Filter geometry / weights (matches the PyTorch module exactly).
# ---------------------------------------------------------------------------
def _selector(rows: int, module_size: int, u: np.ndarray) -> np.ndarray:
    """Block-diagonal selector (rows, rows*ms): row i carries u at cols [i*ms, (i+1)*ms)."""
    s = np.zeros((rows, rows * module_size), dtype=np.float32)
    for i in range(rows):
        s[i, i * module_size:(i + 1) * module_size] = u
    return s


# ---------------------------------------------------------------------------
# Tiling heuristics.
# ---------------------------------------------------------------------------
def _divisors(n: int):
    return [d for d in range(1, n + 1) if n % d == 0]


def _choose_w_tile(W: int, Wo: int, module_size: int, *, b_budget: int = 4 * _MiB) -> int:
    """Tile W (third grid axis) only when a fully resident (Wo, W) selector would be too large
    (very wide images, the v7x 64 MiB case).  Tiles are multiples of 128*ms so the weight block
    (Wo_t, Wt), the x block and the output block all stay lane-legal; block-diagonality of the
    selector means no accumulation is needed across W tiles."""
    if Wo * W * 4 <= b_budget:
        return W
    step = 128 * module_size
    cands = [wt for wt in range(step, W, step)
             if W % wt == 0 and (wt // module_size) * wt * 4 <= b_budget]
    return max(cands) if cands else W


def _choose_tiles(N: int, Ho: int, W: int, Wt: int, bytes_per_row_block: int,
                  sublane: int, *, target: int, cap: int):
    """Pick (Nb, Ho_t).  Per-step input block = Nb * Ho_t * bytes_per_row_block.

    Preference order:
      1. legality: Ho_t % sublane == 0 or Ho_t == Ho (sublane rule for input/output blocks)
      2. block <= cap      (keeps double-buffered footprint inside the VMEM budget below)
      3. block >= target   (~2 MiB+ amortizes the ~0.35 us/step overhead, v7x HBM @3.2 TB/s)
      4. even total step count >= 2 (v7x: two TensorCores split the parallel grid)
      5. largest block (single-TC v5e/v6e: bigger blocks only help)
    """
    hot_cands = [h for h in _divisors(Ho) if h % sublane == 0 or h == Ho]
    nb_cands = _divisors(N)
    all_cfg = [(nb, hot) for nb in nb_cands for hot in hot_cands]

    def blk(c):
        return c[0] * c[1] * bytes_per_row_block

    def steps(c):
        return (N // c[0]) * (Ho // c[1]) * (W // Wt)

    legal = [c for c in all_cfg if blk(c) <= cap]
    if not legal:
        # Even the smallest legal tile busts the cap; take it and let the vmem_limit below
        # reflect the real need (fail loudly rather than under-provide the compiler).
        return min(all_cfg, key=blk)
    pool = [c for c in legal if blk(c) >= target] or legal
    even = [c for c in pool if steps(c) % 2 == 0]
    pool = even or pool
    return max(pool, key=blk)


# ---------------------------------------------------------------------------
# Kernels.
# ---------------------------------------------------------------------------
def _make_row_sparse_kernel(n_rows: int):
    """x arrives as n_rows (=2r) separate centre-row planes, (Nb, Ho_t, Wt) each.  The block mean
    is a row-sum (VPU) followed by one MXU contraction with the pre-scaled column selector."""
    def kernel(*refs):
        x_refs = refs[:n_rows]
        b_ref, o_ref = refs[n_rows], refs[n_rows + 1]
        nb, hot, wt = x_refs[0].shape
        acc = x_refs[0][...].astype(jnp.float32)
        for k in range(1, n_rows):
            acc = acc + x_refs[k][...].astype(jnp.float32)
        b = b_ref[...]                                                   # (Wo_t, Wt), w = 1/(2r)^2
        out = lax.dot_general(acc.reshape(nb * hot, wt), b,
                              (((1,), (1,)), ((), ())),
                              preferred_element_type=jnp.float32)        # (nb*hot, Wo_t)
        o_ref[...] = out.reshape(nb, hot, b.shape[0]).astype(o_ref.dtype)
    return kernel


def _dense_kernel(x_ref, a_ref, b_ref, o_ref):
    """Fallback: separable selector matmuls A @ x @ B^T on full row bands (any W)."""
    a = a_ref[...]                                                       # (Ho_t, Ht)
    b = b_ref[...]                                                       # (Wo_t, Wt)
    for n in range(x_ref.shape[0]):          # static unroll; store per-iteration -> bounded live ranges
        xb = x_ref[n].astype(jnp.float32)                                # (Ht, Wt)
        tmp = jnp.dot(a, xb, preferred_element_type=jnp.float32)         # (Ho_t, Wt)
        part = lax.dot_general(tmp, b, (((1,), (1,)), ((), ())),
                               preferred_element_type=jnp.float32)       # (Ho_t, Wo_t)
        o_ref[n] = part.astype(o_ref.dtype)


# ---------------------------------------------------------------------------
# Wrapper.
# ---------------------------------------------------------------------------
def region_mean_filter(x: jax.Array, module_size: int, *,
                       row_sparse=None, stream_dtype=None) -> jax.Array:
    """Pallas TPU implementation of RegionMeanFilter.forward.

    x: (N, 1, H, W) with H, W divisible by module_size.  Returns (N, 1, H/ms, W/ms) in x.dtype.
    row_sparse: None = auto (use the row-sparse HBM path whenever it is lane-legal).
    stream_dtype: optional narrower streaming dtype (e.g. jnp.bfloat16); f32 accumulation,
                  output keeps x.dtype.  Off by default (preserves f32 tolerance).
    """
    N, C, H, W = x.shape
    ms = module_size
    assert C == 1, "RegionMeanFilter expects a single input channel"
    assert ms >= 2 and H % ms == 0 and W % ms == 0
    Ho, Wo = H // ms, W // ms
    out_dtype = x.dtype

    center = int(ms / 2)
    radius = math.ceil(ms / 6)
    lo, hi = center - radius, center + radius
    assert 0 <= lo < hi <= ms
    n_rows = hi - lo                                   # = 2r weighted rows / cols per module
    u_ind = np.zeros((ms,), dtype=np.float32)
    u_ind[lo:hi] = 1.0

    if stream_dtype is not None:
        x = x.astype(stream_dtype)
    itemsize = jnp.dtype(x.dtype).itemsize
    sublane = 8 * 4 // itemsize                        # 8 (f32), 16 (bf16), 32 (int8/fp8)

    if row_sparse is None:
        row_sparse = (W % 128 == 0) and (n_rows < ms)
    if row_sparse and W % 128 != 0:
        raise ValueError("row_sparse path needs W % 128 == 0 (lane-legal per-row blocks)")

    # ---- VMEM budget (v7x 64 MiB/TC is the binding case; tile caps derived from the same number)
    try:
        vmem_cap = pltpu.get_tpu_info().vmem_capacity_bytes
    except Exception:                                  # best-effort hardware query
        vmem_cap = 64 * _MiB
    vmem_budget = min(40 * _MiB, (5 * vmem_cap) // 8)  # leave Mosaic internal-scratch headroom
    block_cap = 12 * _MiB                              # per-step *input* block cap
    dma_target = 2 * _MiB                              # per-step input DMA target (amortize 0.35us)

    # ---- tiling ---------------------------------------------------------------------------------
    Wt = _choose_w_tile(W, Wo, ms)
    Wo_t = Wt // ms
    bytes_per_row_block = (n_rows if row_sparse else ms) * Wt * itemsize
    Nb, Ho_t = _choose_tiles(N, Ho, W, Wt, bytes_per_row_block, sublane,
                             target=dma_target, cap=block_cap)
    Ht = Ho_t * ms
    grid = (N // Nb, Ho // Ho_t, W // Wt)

    # ---- specs, weights & kernel ----------------------------------------------------------------
    out_shape = jax.ShapeDtypeStruct((N, Ho, Wo), out_dtype)
    out_spec = pl.BlockSpec((Nb, Ho_t, Wo_t), lambda n, h, w: (n, h, w))

    if row_sparse:
        x_view = x.reshape(N, Ho, ms * W)              # free, row-major metadata reshape
        wpb = W // Wt                                  # W-blocks per image row

        def row_spec(k):
            base = (lo + k) * wpb                      # block index of centre row lo+k, W-tile 0
            return pl.BlockSpec((Nb, Ho_t, Wt),
                                lambda n, h, w, base=base: (n, h, base + w))

        b_sp = jnp.asarray(_selector(Wo, ms, u_ind / float(n_rows * n_rows)))   # weights baked in
        in_specs = ([row_spec(k) for k in range(n_rows)]
                    + [pl.BlockSpec((Wo_t, Wt), lambda n, h, w: (w, w))])
        operands = [x_view] * n_rows + [b_sp]
        kernel = _make_row_sparse_kernel(n_rows)
        in_block = n_rows * Nb * Ho_t * Wt * itemsize
        weight_block = Wo_t * Wt * 4
    else:
        x_view = x.reshape(N, H, W)
        u_norm = u_ind / float(n_rows)
        a_tile = jnp.asarray(_selector(Ho_t, ms, u_norm))          # (Ho_t, Ht), per-tile selector
        b_dense = jnp.asarray(_selector(Wo, ms, u_norm))           # (Wo, W)
        in_specs = [pl.BlockSpec((Nb, Ht, Wt), lambda n, h, w: (n, h, w)),
                    pl.BlockSpec((Ho_t, Ht), lambda n, h, w: (0, 0)),
                    pl.BlockSpec((Wo_t, Wt), lambda n, h, w: (w, w))]
        operands = [x_view, a_tile, b_dense]
        kernel = _dense_kernel
        in_block = Nb * Ht * Wt * itemsize
        weight_block = Ho_t * Ht * 4 + Wo_t * Wt * 4

    out_block = Nb * Ho_t * Wo_t * jnp.dtype(out_dtype).itemsize
    # Double-buffered blocks + weights + slack; never hand Mosaic less than the tiles require.
    need = 2 * (in_block + out_block + weight_block) + 4 * _MiB
    vmem_limit = int(min(max(need, 16 * _MiB), max(vmem_budget, need)))

    out3 = pl.pallas_call(
        kernel,
        out_shape=out_shape,
        grid_spec=pltpu.PrefetchScalarGridSpec(
            num_scalar_prefetch=0,
            grid=grid,
            in_specs=in_specs,
            out_specs=out_spec,
        ),
        compiler_params=pltpu.CompilerParams(
            dimension_semantics=("parallel", "parallel", "parallel"),
            vmem_limit_bytes=vmem_limit,
        ),
    )(*operands)

    return out3.reshape(N, 1, Ho, Wo)                  # free reshape; no transpose needed


# ---------------------------------------------------------------------------
# Reference + demo.
# ---------------------------------------------------------------------------
def _reference(x: np.ndarray, module_size: int) -> np.ndarray:
    """NumPy (f64) mirror of the PyTorch module."""
    center = int(module_size / 2)
    radius = math.ceil(module_size / 6)
    w2d = np.zeros((module_size, module_size), dtype=np.float64)
    w2d[center - radius:center + radius, center - radius:center + radius] = 1.0
    w2d /= w2d.sum()
    N, C, H, W = x.shape
    Ho, Wo = H // module_size, W // module_size
    xb = x.astype(np.float64).reshape(N, C, Ho, module_size, Wo, module_size)
    return np.einsum('nciajb,ab->ncij', xb, w2d)


if __name__ == "__main__":
    k1, k2 = jax.random.split(jax.random.PRNGKey(0))

    # Case 1: ms=8, W % 128 == 0 -> row-sparse streaming path (only 4 of every 8 rows are read).
    x1 = jax.random.uniform(k1, (8, 1, 128, 128), dtype=jnp.float32)
    y1 = jax.block_until_ready(region_mean_filter(x1, 8))
    assert y1.shape == (8, 1, 16, 16)
    assert np.allclose(np.asarray(y1), _reference(np.asarray(x1), 8), atol=1e-5, rtol=1e-5)

    # Case 2: ms=16, W % 128 != 0 and Ho < 8 -> dense selector-matmul fallback path.
    x2 = jax.random.uniform(k2, (2, 1, 64, 192), dtype=jnp.float32)
    y2 = jax.block_until_ready(region_mean_filter(x2, 16))
    assert y2.shape == (2, 1, 4, 12)
    assert np.allclose(np.asarray(y2), _reference(np.asarray(x2), 16), atol=1e-5, rtol=1e-5)

    # Case 3: opt-in bf16 streaming (halves HBM read bytes; f32 accumulation, f32 output).
    y3 = jax.block_until_ready(region_mean_filter(x1, 8, stream_dtype=jnp.bfloat16))
    assert np.allclose(np.asarray(y3), _reference(np.asarray(x1), 8), atol=2e-2, rtol=2e-2)

    print("KERNEL_OK")
</pallas_src>

<mosaic_0001>
module attributes {stable_mosaic.version = 11 : i64} {
  func.func @kernel(%arg0: i32, %arg1: i32, %arg2: i32, %arg3: memref<4x16x128xf32, #tpu.memory_space<vmem>>, %arg4: memref<4x16x128xf32, #tpu.memory_space<vmem>>, %arg5: memref<4x16x128xf32, #tpu.memory_space<vmem>>, %arg6: memref<4x16x128xf32, #tpu.memory_space<vmem>>, %arg7: memref<16x128xf32, #tpu.memory_space<vmem>>, %arg8: memref<4x16x16xf32, #tpu.memory_space<vmem>>) attributes {dimension_semantics = [#tpu.dimension_semantics<parallel>, #tpu.dimension_semantics<parallel>, #tpu.dimension_semantics<parallel>], iteration_bounds = array<i64: 2, 1, 1>, scalar_prefetch = 0 : i64, scratch_operands = 0 : i64, tpu.core_type = #tpu.core_type<tc>, window_params = [{transform_indices = @transform_0, window_bounds = array<i64: 4, 16, 128>}, {transform_indices = @transform_1, window_bounds = array<i64: 4, 16, 128>}, {transform_indices = @transform_2, window_bounds = array<i64: 4, 16, 128>}, {transform_indices = @transform_3, window_bounds = array<i64: 4, 16, 128>}, {transform_indices = @transform_4, window_bounds = array<i64: 16, 128>}, {transform_indices = @transform_5, window_bounds = array<i64: 4, 16, 16>}]} {
    %c0 = arith.constant 0 : index
    %c0_0 = arith.constant 0 : index
    %c0_1 = arith.constant 0 : index
    %0 = vector.load %arg3[%c0, %c0_0, %c0_1] : memref<4x16x128xf32, #tpu.memory_space<vmem>>, vector<4x16x128xf32>
    %c0_2 = arith.constant 0 : index
    %c0_3 = arith.constant 0 : index
    %c0_4 = arith.constant 0 : index
    %1 = vector.load %arg4[%c0_2, %c0_3, %c0_4] : memref<4x16x128xf32, #tpu.memory_space<vmem>>, vector<4x16x128xf32>
    %2 = arith.addf %0, %1 : vector<4x16x128xf32>
    %c0_5 = arith.constant 0 : index
    %c0_6 = arith.constant 0 : index
    %c0_7 = arith.constant 0 : index
    %3 = vector.load %arg5[%c0_5, %c0_6, %c0_7] : memref<4x16x128xf32, #tpu.memory_space<vmem>>, vector<4x16x128xf32>
    %4 = arith.addf %2, %3 : vector<4x16x128xf32>
    %c0_8 = arith.constant 0 : index
    %c0_9 = arith.constant 0 : index
    %c0_10 = arith.constant 0 : index
    %5 = vector.load %arg6[%c0_8, %c0_9, %c0_10] : memref<4x16x128xf32, #tpu.memory_space<vmem>>, vector<4x16x128xf32>
    %6 = arith.addf %4, %5 : vector<4x16x128xf32>
    %c0_11 = arith.constant 0 : index
    %c0_12 = arith.constant 0 : index
    %7 = vector.load %arg7[%c0_11, %c0_12] : memref<16x128xf32, #tpu.memory_space<vmem>>, vector<16x128xf32>
    %8 = vector.shape_cast %6 : vector<4x16x128xf32> to vector<64x128xf32>
    %cst = arith.constant dense<0.000000e+00> : vector<64x16xf32>
    %9 = tpu.matmul %8, %7, %cst {dimension_numbers = #tpu.dot_dimension_numbers<[1], [1], [0], [0], [0, 0, 1, 0], [], []>} : vector<64x128xf32>, vector<16x128xf32>, vector<64x16xf32> -> vector<64x16xf32>
    %10 = vector.shape_cast %9 : vector<64x16xf32> to vector<4x16x16xf32>
    %c0_13 = arith.constant 0 : index
    %c0_14 = arith.constant 0 : index
    %c0_15 = arith.constant 0 : index
    %11 = vector.load %arg8[%c0_13, %c0_14, %c0_15] : memref<4x16x16xf32, #tpu.memory_space<vmem>>, vector<4x16x16xf32>
    tpu.vector_store %arg8[%c0_13, %c0_14, %c0_15], %10 {strides = array<i32>} : memref<4x16x16xf32, #tpu.memory_space<vmem>>, vector<4x16x16xf32>,
    return
  }
  func.func @transform_0(%arg0: i32, %arg1: i32, %arg2: i32) -> (i32, i32, i32) {
    %c2_i32 = arith.constant 2 : i32
    %0 = arith.addi %c2_i32, %arg2 : i32
    %c0_i32 = arith.constant 0 : i32
    return %arg0, %arg1, %0 : i32, i32, i32
  }
  func.func @transform_1(%arg0: i32, %arg1: i32, %arg2: i32) -> (i32, i32, i32) {
    %c3_i32 = arith.constant 3 : i32
    %0 = arith.addi %c3_i32, %arg2 : i32
    %c0_i32 = arith.constant 0 : i32
    return %arg0, %arg1, %0 : i32, i32, i32
  }
  func.func @transform_2(%arg0: i32, %arg1: i32, %arg2: i32) -> (i32, i32, i32) {
    %c4_i32 = arith.constant 4 : i32
    %0 = arith.addi %c4_i32, %arg2 : i32
    %c0_i32 = arith.constant 0 : i32
    return %arg0, %arg1, %0 : i32, i32, i32
  }
  func.func @transform_3(%arg0: i32, %arg1: i32, %arg2: i32) -> (i32, i32, i32) {
    %c5_i32 = arith.constant 5 : i32
    %0 = arith.addi %c5_i32, %arg2 : i32
    %c0_i32 = arith.constant 0 : i32
    return %arg0, %arg1, %0 : i32, i32, i32
  }
  func.func @transform_4(%arg0: i32, %arg1: i32, %arg2: i32) -> (i32, i32) {
    %c0_i32 = arith.constant 0 : i32
    return %arg2, %arg2 : i32, i32
  }
  func.func @transform_5(%arg0: i32, %arg1: i32, %arg2: i32) -> (i32, i32, i32) {
    %c0_i32 = arith.constant 0 : i32
    return %arg0, %arg1, %arg2 : i32, i32, i32
  }
}

</mosaic_0001>

<bundles_post_ra>
// kernel: tpu_custom_call.1
= control target key start
LH: loop header
LB: loop body
LE: loop exit
PB: predicated region body
PF: predicated region fallthrough
CT: control target
= control target key end

     0   :  { %s1715_s0 = inlined_call_operand.hbm [shape: f32[8,16,1024], index: 0, kind: input, shape index: {}]   ;;  %s1716_s1 = inlined_call_operand.hbm [shape: f32[8,16,1024], index: 1, kind: input, shape index: {}]   ;;  %s1717_s2 = inlined_call_operand.hbm [shape: f32[8,16,1024], index: 2, kind: input, shape index: {}]   ;;  %s1718_s3 = inlined_call_operand.hbm [shape: f32[8,16,1024], index: 3, kind: input, shape index: {}]   ;;  %s1719_s4 = inlined_call_operand.hbm [shape: f32[16,128], index: 4, kind: input, shape index: {}]   ;;  %s1720_s5 = inlined_call_operand.hbm [shape: f32[8,16,16], index: 5, kind: output, shape index: {}]  }
   0x1   :  { %1738 = sst [smem:[#allocation22_spill]] %s1716_s1 }
   0x2   :  { %1739 = sst [smem:[#allocation23_spill]] %s1719_s4 }
   0x3   :  { %10 = vsyncpa [#allocation3], 0 }
   0x4   :  { %12 = vsyncpa [#allocation3 + $0x1], 0 }
   0x5   :  { %13 = vsyncpa [#allocation6], 0 }
   0x6   :  { %15 = vsyncpa [#allocation6 + $0x1], 0 }
   0x7   :  { %16 = vsyncpa [#allocation9], 0 }
   0x8   :  { %18 = vsyncpa [#allocation9 + $0x1], 0 }
   0x9   :  { %19 = vsyncpa [#allocation4], 0 }
   0xa   :  { %21 = vsyncpa [#allocation4 + $0x1], 0  ;;  %s1298_s18 = smov 0   ;;  %s1300_s19 = smov 0  }
   0xb   :  { %s1302_s20 = smov 0   ;;  %s1304_s21 = smov 0  }
   0xc   :  { %s1306_s22 = smov 0   ;;  %s1308_s23 = smov 0  }
   0xd LB: > { %1740 = sst [smem:[#allocation17_spill]] %s1235_s18  ;;  %s1329_s24 = sadd.s32 4294967295, %s1255_s23   ;;  %s1255_s23 = sphi %s1308_s23, %s27_s23   ;;  %s1251_s22 = sphi %s1306_s22, %s1774_s22   ;;  %s1247_s21 = sphi %s1304_s21, %s1773_s21   ;;  %s1243_s20 = sphi %s1302_s20, %s1777_s20   ;;  %s1239_s19 = sphi %s1300_s19, %s1776_s19   ;;  %s1235_s18 = sphi %s1298_s18, %s1775_s18  }
   0xe   : > { %1741 = sst [smem:[#allocation18_spill]] %s1251_s22  ;;  %s849_s25 = sadd.s32 4294967294, %s1255_s23  }
   0xf   : > { %s59_s26 = sadd.s32 1, %s1243_s20  ;;  %p66_p0 = scmp.ne.s32.totalorder %s1243_s20, %s1239_s19 }
  0x10   : > { %p67_p1 = scmp.eq.s32.totalorder %s1255_s23, 0  ;;  %p72_p2 = scmp.ne.s32.totalorder %s1239_s19, %s1235_s18 }
  0x11   : > { %p1721_p3 = scmp.eq.s32.totalorder %s1329_s24, 0  ;;  %p224_p4 = scmp.eq.s32.totalorder %s1329_s24, 1 }
  0x12   : > { %p1340_p5 = por %p67_p1, %p66_p0  ;;  %p230_p6 = scmp.eq.s32.totalorder %s849_s25, 1 }
  0x13   : > { %p1346_p7 = por %p1721_p3, %p72_p2  ;;  %p1350_p8 = por %p224_p4, %p66_p0 }
  0x14   : > { %p1354_p9 = por %p230_p6, %p72_p2  ;;  %p850_p10 = scmp.ge.s32.totalorder %s1255_s23, 1 }
  0x15   : > { %s1743_s28 = scalar_select %p1346_p7, 1, 0 }
  0x16   : > { %s1744_s29 = scalar_select %p1350_p8, 1, 0 }
  0x17   : > { %s1745_s30 = scalar_select %p1354_p9, 1, 0 }
  0x18   : > { %p237_p11 = scmp.lt.s32.totalorder %s1255_s23, 3  ;;  %s1257_s7 = smov [#allocation10]  }
  0x19   : > { %1746 = sst [smem:[#allocation19_spill]] %s1745_s30  ;;  %s253_s8 = sshll.u32 %s1257_s7, 4  ;;  %s1364_s8 = int_to_ptr.vmem [resolvable:$true] %s253_s8 }
  0x1a   : > { %p1360_p12 = pnand %p850_p10, %p237_p11  ;;  %p952_p1 = scmp.lt.s32.totalorder %s1255_s23, 2 }
  0x1b   : > { %s46_s11 = sadd.s32 1, %s1251_s22  ;;  %s1751_s4 = sld [smem:[#allocation23_spill]] }
  0x1c   : > { %s1747_s6 = scalar_select %p1360_p12, 1, 0 }
  0x1d   : > { %p930_p13 = pneg %p1360_p12  ;;  %p1378_p4 = pnand %p952_p1, %p1340_p5 }
  0x1e   : > { %p1383_p6 = scmp.ge.s32.totalorder %s46_s11, 2 }
  0x1f   : > { %p1372_p2 = pnand %p930_p13, %p1721_p3 }
  0x20   : > { %s1749_s10 = scalar_select %p1378_p4, 1, 0 }
  0x21   : > { %s1750_s12 = scalar_select %p1383_p6, 1, 0 }
  0x22   : > { %s1009_s15 = scalar_lea.hbm %s1751_s4, 256  ;;  %p1011_p11 = pneg %p1372_p2 }
  0x23   : > { %p1010_p10 = scmp.ne.s32.totalorder %s1751_s4, %s1009_s15  ;;  %p1016_p1 = scmp.lt.u32.totalorder %s1009_s15, %s1751_s4 }
  0x25   : > { %p1012_p13 = pnand %p1011_p11, %p1010_p10 }
  0x27   : > { %p1013_p5 = pneg %p1012_p13 }
  0x29   : > { %p1018_p0 = pnand %p1016_p1, %p1013_p5 }
  0x2b   : > { %1021 = shalt.err (!%p1018_p0)
}
  0x2c   : > { %s1022_s7 = scalar_lea.vmem %s1364_s8, 256  ;;  %p1030_p7 = scmp.lt.s32.totalorder %s1364_s8, %s1364_s8 }
  0x2d   : > { %p1023_p3 = scmp.ne.s32.totalorder %s1364_s8, %s1022_s7  ;;  %p1031_p12 = scmp.lt.s32.totalorder %s1022_s7, %s1022_s7 }
  0x2f   : > { %p1025_p9 = pnand %p1023_p3, %p1011_p11  ;;  %p1032_p4 = por %p1031_p12, %p1030_p7 }
  0x31   : > { %p1026_p8 = pneg %p1025_p9 }
  0x33   : > { %p1033_p6 = pnand %p1032_p4, %p1026_p8 }
  0x35   : > { %1036 = shalt.err (!%p1033_p6)
}
  0x36   : > { %s1727_s13 = smov 128   ;;  %s1729_s14 = smov 8  }
  0x37   : > { %933 = dma.hbm_to_vmem [thread:$0]  (!%p1372_p2), %s1751_s4, 256, %s1364_s8, [#allocation9], %s1727_s13, %s1727_s13, %s1729_s14  }
  0x38   : > { %s1731_s17 = sand.u32 1, %s1243_s20   ;;  %p1752_p3 = scmp.ne.s32.totalorder %s1750_s12, 0 }
  0x39   : > { %s1418_s25 = sshll.u32 %s1731_s17, 6  ;;  %s1421_s27 = sshll.u32 %s1251_s22, 13 }
  0x3a   : > { %s1779_s11 = smov (%p1752_p3, %s46_s11), 0  ;;  %s1733_s7 = sand.u32 1, %s1255_s23  }
  0x3b   : > { %1753 = sst [smem:[#allocation20_spill]] %s1779_s11  ;;  %s52_s9 = ssub.s32 %s1251_s22, %s1779_s11 }
  0x3c   : > { %p57_p7 = scmp.eq.s32.totalorder %s52_s9, 0  ;;  %s1755_s1 = sld [smem:[#allocation22_spill]] }
  0x3d   : > { %s298_s16 = scalar_lea.vmem [#allocation5], %s1418_s25  ;;  %s1442_s17 = scalar_lea.sflag [#allocation6], %s1733_s7 }
  0x3e   : > { %s1429_s30 = scalar_select %p57_p7, %s1243_s20, %s59_s26  }
  0x3f   : > { %s311_s13 = sshll.u32 %s298_s16, 4  ;;  %p1756_p9 = scmp.ne.s32.totalorder %s1749_s10, 0  ;;  %s1438_s13 = int_to_ptr.vmem [resolvable:$true] %s311_s13 }
  0x40   : > { %1754 = sst [smem:[#allocation21_spill]] %s1429_s30 }
  0x41   : > { %p1447_p12 = pneg %p1756_p9 }
  0x42   : > { %s716_s12 = scalar_lea.hbm %s1755_s1, %s1421_s27  ;;  %s1042_s16 = scalar_lea.hbm %s1755_s1, 16384 }
  0x43   : > { %s1436_s14 = scalar_lea.hbm %s716_s12, 384  ;;  %s1067_s9 = scalar_lea.hbm %s716_s12, 1408 }
  0x44   : > { %p1038_p8 = scmp.ne.s32.totalorder %s1436_s14, %s1067_s9  ;;  %p1043_p4 = scmp.lt.u32.totalorder %s1436_s14, %s1755_s1 }
  0x45   : > { %p1044_p6 = scmp.lt.u32.totalorder %s1042_s16, %s1067_s9  ;;  %p1046_p11 = scmp.lt.u32.totalorder %s1067_s9, %s1436_s14 }
  0x46   : > { %p1040_p0 = pnand %p1447_p12, %p1038_p8 }
  0x47   : > { %p1045_p10 = por %p1044_p6, %p1043_p4 }
  0x48   : > { %p1041_p2 = pneg %p1040_p0 }
  0x49   : > { %p1047_p13 = por %p1046_p11, %p1045_p10 }
  0x4b   : > { %p1048_p5 = pnand %p1047_p13, %p1041_p2 }
  0x4d   : > { %1051 = shalt.err (!%p1048_p5)
}
  0x4e   : > { %s1052_s12 = scalar_lea.vmem %s1438_s13, 1024  ;;  %s1260_s8 = smov [#allocation5]  }
  0x4f   : > { %p1053_p1 = scmp.ne.s32.totalorder %s1438_s13, %s1052_s12  ;;  %s1057_s15 = sshll.u32 %s1260_s8, 4  ;;  %s1058_s15 = int_to_ptr.vmem [resolvable:$false] %s1057_s15 }
  0x50   : > { %s1059_s4 = scalar_lea.vmem %s1058_s15, 2048  ;;  %p1060_p8 = scmp.lt.s32.totalorder %s1438_s13, %s1058_s15 }
  0x51   : > { %p1055_p3 = pnand %p1053_p1, %p1447_p12  ;;  %p1061_p0 = scmp.lt.s32.totalorder %s1059_s4, %s1052_s12 }
  0x53   : > { %p1056_p7 = pneg %p1055_p3  ;;  %p1062_p4 = por %p1061_p0, %p1060_p8 }
  0x55   : > { %p1063_p6 = pnand %p1062_p4, %p1056_p7 }
  0x57   : > { %1066 = shalt.err (!%p1063_p6)
}
  0x58   : > { %s1736_s11 = smov 1024   ;;  %s1758_s9 = smov 8  }
  0x59   : > { %s1759_s16 = smov 128   ;;  %s706_s12 = scalar_lea.hbm %s1715_s0, %s1421_s27 }
  0x5a   : > { %940 = dma.hbm_to_vmem [thread:$0]  (!%p1756_p9), %s1436_s14, 1024, %s1438_s13, %s1442_s17, %s1736_s11, %s1759_s16, %s1758_s9  }
  0x5b   : > { %s1478_s4 = scalar_lea.hbm %s706_s12, 256  ;;  %s271_s7 = scalar_lea.vmem [#allocation2], %s1418_s25 }
  0x5c   : > { %s284_s1 = sshll.u32 %s271_s7, 4  ;;  %s1760_s22 = sand.u32 1, %s1243_s20   ;;  %s1481_s1 = int_to_ptr.vmem [resolvable:$true] %s284_s1 }
  0x5d   : > { %s1485_s30 = scalar_lea.sflag [#allocation3], %s1760_s22  ;;  %s1098_s18 = scalar_lea.hbm %s706_s12, 1280 }
  0x5e   : > { %p1069_p2 = scmp.ne.s32.totalorder %s1478_s4, %s1098_s18  ;;  %s1073_s8 = scalar_lea.hbm %s1715_s0, 16384 }
  0x5f   : > { %p1074_p13 = scmp.lt.u32.totalorder %s1478_s4, %s1715_s0  ;;  %p1075_p5 = scmp.lt.u32.totalorder %s1073_s8, %s1098_s18 }
  0x60   : > { %p1071_p10 = pnand %p1069_p2, %p1447_p12  ;;  %p1077_p3 = scmp.lt.u32.totalorder %s1098_s18, %s1478_s4 }
  0x61   : > { %p1076_p1 = por %p1075_p5, %p1074_p13 }
  0x62   : > { %p1072_p11 = pneg %p1071_p10 }
  0x63   : > { %p1078_p7 = por %p1077_p3, %p1076_p1 }
  0x65   : > { %p1079_p8 = pnand %p1078_p7, %p1072_p11 }
  0x67   : > { %1082 = shalt.err (!%p1079_p8)
}
  0x68   : > { %s1083_s22 = scalar_lea.vmem %s1481_s1, 1024  ;;  %s1262_s7 = smov [#allocation2]  }
  0x69   : > { %p1084_p0 = scmp.ne.s32.totalorder %s1481_s1, %s1083_s22  ;;  %s1088_s12 = sshll.u32 %s1262_s7, 4  ;;  %s1089_s12 = int_to_ptr.vmem [resolvable:$false] %s1088_s12 }
  0x6a   : > { %s1090_s11 = scalar_lea.vmem %s1089_s12, 2048  ;;  %p1091_p2 = scmp.lt.s32.totalorder %s1481_s1, %s1089_s12 }
  0x6b   : > { %p1086_p4 = pnand %p1084_p0, %p1447_p12  ;;  %p1092_p10 = scmp.lt.s32.totalorder %s1090_s11, %s1083_s22 }
  0x6d   : > { %p1087_p6 = pneg %p1086_p4  ;;  %p1093_p13 = por %p1092_p10, %p1091_p2 }
  0x6f   : > { %p1094_p5 = pnand %p1093_p13, %p1087_p6 }
  0x71   : > { %1097 = shalt.err (!%p1094_p5)
}
  0x72   : > { %s1761_s18 = smov 1024   ;;  %s726_s8 = scalar_lea.hbm %s1717_s2, %s1421_s27 }
  0x73   : > { %937 = dma.hbm_to_vmem [thread:$0]  (!%p1756_p9), %s1478_s4, 1024, %s1481_s1, %s1485_s30, %s1761_s18, %s1759_s16, %s1758_s9  }
  0x74   : > { %s325_s15 = scalar_lea.vmem [#allocation7], %s1418_s25  ;;  %s1516_s7 = scalar_lea.hbm %s726_s8, 512 }
  0x75   : > { %s338_s22 = sshll.u32 %s325_s15, 4  ;;  %s1129_s12 = scalar_lea.hbm %s726_s8, 1536  ;;  %s1518_s22 = int_to_ptr.vmem [resolvable:$true] %s338_s22 }
  0x76   : > { %p1100_p11 = scmp.ne.s32.totalorder %s1516_s7, %s1129_s12  ;;  %s1104_s30 = scalar_lea.hbm %s1717_s2, 16384 }
  0x77   : > { %p1105_p7 = scmp.lt.u32.totalorder %s1516_s7, %s1717_s2  ;;  %p1106_p8 = scmp.lt.u32.totalorder %s1104_s30, %s1129_s12 }
  0x78   : > { %p1102_p1 = pnand %p1100_p11, %p1447_p12  ;;  %p1108_p4 = scmp.lt.u32.totalorder %s1129_s12, %s1516_s7 }
  0x79   : > { %p1107_p0 = por %p1106_p8, %p1105_p7 }
  0x7a   : > { %p1103_p3 = pneg %p1102_p1 }
  0x7b   : > { %p1109_p6 = por %p1108_p4, %p1107_p0 }
  0x7d   : > { %p1110_p2 = pnand %p1109_p6, %p1103_p3 }
  0x7f   : > { %1113 = shalt.err (!%p1110_p2)
}
  0x80   : > { %s1114_s14 = scalar_lea.vmem %s1518_s22, 1024  ;;  %s1263_s8 = smov [#allocation7]  }
  0x81   : > { %p1115_p10 = scmp.ne.s32.totalorder %s1518_s22, %s1114_s14  ;;  %s1119_s15 = sshll.u32 %s1263_s8, 4  ;;  %s1120_s15 = int_to_ptr.vmem [resolvable:$false] %s1119_s15 }
  0x82   : > { %s1121_s11 = scalar_lea.vmem %s1120_s15, 2048  ;;  %p1122_p11 = scmp.lt.s32.totalorder %s1518_s22, %s1120_s15 }
  0x83   : > { %p1117_p13 = pnand %p1115_p10, %p1447_p12  ;;  %p1123_p1 = scmp.lt.s32.totalorder %s1121_s11, %s1114_s14 }
  0x85   : > { %p1118_p5 = pneg %p1117_p13  ;;  %p1124_p7 = por %p1123_p1, %p1122_p11 }
  0x87   : > { %p1125_p8 = pnand %p1124_p7, %p1118_p5 }
  0x89   : > { %1128 = shalt.err (!%p1125_p8)
}
  0x8a   : > { %943 = dma.hbm_to_vmem [thread:$0]  (!%p1756_p9), %s1516_s7, 1024, %s1518_s22, %s1442_s17, %s1761_s18, %s1759_s16, %s1758_s9  }
  0x8b   : > { %s736_s30 = scalar_lea.hbm %s1718_s3, %s1421_s27  ;;  %s352_s13 = scalar_lea.vmem [#allocation8], %s1418_s25 }
  0x8c   : > { %s1548_s4 = scalar_lea.hbm %s736_s30, 640  ;;  %s365_s14 = sshll.u32 %s352_s13, 4  ;;  %s1551_s14 = int_to_ptr.vmem [resolvable:$true] %s365_s14 }
  0x8d   : > { %s1762_s8 = sand.u32 1, %s1255_s23   ;;  %s1160_s11 = scalar_lea.hbm %s736_s30, 1664 }
  0x8e   : > { %s1555_s15 = scalar_lea.sflag [#allocation9], %s1762_s8  ;;  %p1131_p3 = scmp.ne.s32.totalorder %s1548_s4, %s1160_s11 }
  0x8f   : > { %s1135_s27 = scalar_lea.hbm %s1718_s3, 16384  ;;  %p1136_p6 = scmp.lt.u32.totalorder %s1548_s4, %s1718_s3 }
  0x90   : > { %p1133_p0 = pnand %p1131_p3, %p1447_p12  ;;  %p1137_p2 = scmp.lt.u32.totalorder %s1135_s27, %s1160_s11 }
  0x91   : > { %p1139_p13 = scmp.lt.u32.totalorder %s1160_s11, %s1548_s4 }
  0x92   : > { %p1134_p4 = pneg %p1133_p0  ;;  %p1138_p10 = por %p1137_p2, %p1136_p6 }
  0x94   : > { %p1140_p5 = por %p1139_p13, %p1138_p10 }
  0x96   : > { %p1141_p11 = pnand %p1140_p5, %p1134_p4 }
  0x98   : > { %1144 = shalt.err (!%p1141_p11)
}
  0x99   : > { %s1145_s25 = scalar_lea.vmem %s1551_s14, 1024  ;;  %s1264_s1 = smov [#allocation8]  }
  0x9a   : > { %p1146_p1 = scmp.ne.s32.totalorder %s1551_s14, %s1145_s25  ;;  %s1150_s30 = sshll.u32 %s1264_s1, 4  ;;  %s1151_s30 = int_to_ptr.vmem [resolvable:$false] %s1150_s30 }
  0x9b   : > { %s1152_s13 = scalar_lea.vmem %s1151_s30, 2048  ;;  %p1153_p3 = scmp.lt.s32.totalorder %s1551_s14, %s1151_s30 }
  0x9c   : > { %p1148_p7 = pnand %p1146_p1, %p1447_p12  ;;  %p1154_p0 = scmp.lt.s32.totalorder %s1152_s13, %s1145_s25 }
  0x9e   : > { %p1149_p8 = pneg %p1148_p7  ;;  %p1155_p6 = por %p1154_p0, %p1153_p3 }
  0xa0   : > { %p1156_p2 = pnand %p1155_p6, %p1149_p8 }
  0xa2   : > { %1159 = shalt.err (!%p1156_p2)
}
  0xa3   : > { %946 = dma.hbm_to_vmem [thread:$0]  (!%p1756_p9), %s1548_s4, 1024, %s1551_s14, %s1555_s15, %s1761_s18, %s1759_s16, %s1758_s9  }
  0xa4   : > { %p1763_p12 = scmp.ne.s32.totalorder %s1747_s6, 0 }
  0xa5   : > { %s1584_s26 = sand.u32 (!%p1763_p12), 1, %s1239_s19   ;;  %p1764_p4 = scmp.ne.s32.totalorder (!%p1763_p12), %s1743_s28, 0 }
  0xa6   : > { %377 = sbr.rel (%p1763_p12) target bundleno = 430 (0x1ae), region = 40  ;;  %s1587_s8 = sshll.u32 (!%p1763_p12), %s1584_s26, 6 }
  0xa7   : > { %s380_s10 = scalar_lea.sflag (!%p1763_p12), [#allocation3], %s1584_s26  ;;  %s1591_s11 = scalar_lea.vmem (!%p1763_p12), [#allocation2], %s1587_s8 }
  0xad   : > { %1214 = dma.done.wait (%p1764_p4), %s380_s10, 1024  }
  0xae   : > { %1216 = vsyncadd (%p1764_p4), %s380_s10, 4294966272  ;;  %s388_s6 = sand.u32 1, %s1329_s24   ;;  %s1599_s16 = scalar_lea.vmem [#allocation5], %s1587_s8 }
  0xaf   : > { %s389_s9 = scalar_lea.sflag [#allocation6], %s388_s6 }
  0xb0   : > { %1218 = dma.done.wait (%p1764_p4), %s389_s9, 2048  }
  0xb1   : > { %1220 = vsyncadd (%p1764_p4), %s389_s9, 4294965248  ;;  %s1606_s18 = scalar_lea.vmem [#allocation7], %s1587_s8  ;;  %s407_s4 = scalar_lea.sflag [#allocation9], %s388_s6 }
  0xb2   : > { %s1609_s14 = scalar_lea.vmem [#allocation8], %s1587_s8 }
  0xb3   : > { %1222 = dma.done.wait (%p1764_p4), %s407_s4, 1024  }
  0xb4   : > { %1224 = vsyncadd (%p1764_p4), %s407_s4, 4294966272  ;;  %p1765_p9 = scmp.eq.s32.totalorder %s1329_s24, 0 }
  0xb6   : > { %1226 = dma.done.wait (%p1765_p9), [#allocation9], 256   ;;  %p1766_p10 = pmov %p1765_p9 }
  0xb7   : > { %v527_v0 = vld [vmem:[#allocation10] sm:$0xff]  ;;  %v528_v1 = vld [vmem:[#allocation10 + $0x8] sm:$0xff]  ;;  %v473_v26 = vld [vmem:[%s1591_s11 + $0x10] sm:$0xff]  ;;  %vm634_vm0 = vcmask 130048   ;;  %s455_s24 = scalar_lea.vmem [#allocation11], %s1587_s8  ;;  %s883_s15 = sshll.u32 %s1247_s21, 10 }
  0xb8   : > { %1228 = vsyncadd (%p1766_p10), [#allocation9], 4294967040  ;;  %v471_v2 = vld [vmem:[%s1591_s11] sm:$0xff]  ;;  %v910_v3 = vpack.c.bf16 %v528_v1, %v527_v0  ;;  %v472_v12 = vld [vmem:[%s1591_s11 + $0x8] sm:$0xff]  ;;  %s661_s28 = sshll.u32 %s455_s24, 4  ;;  %s1662_s27 = scalar_lea.hbm %s1720_s5, %s883_s15  ;;  %s1657_s28 = int_to_ptr.vmem [resolvable:$true] %s661_s28 }
  0xb9   : > { %v479_v4 = vld [vmem:[%s1599_s16] sm:$0xff]  ;;  %v480_v13 = vld [vmem:[%s1599_s16 + $0x8] sm:$0xff]  ;;  %v481_v27 = vld [vmem:[%s1599_s16 + $0x10] sm:$0xff]  ;;  %s644_s21 = scalar_lea.sflag [#allocation4], %s1584_s26  ;;  %s1161_s7 = scalar_lea.vmem %s1657_s28, 1024 }
  0xba   : > { %v495_v5 = vld [vmem:[%s1606_s18] sm:$0xff]  ;;  %v487_v6 = vadd.f32 %v479_v4, %v471_v2  ;;  %911 = vmatprep.subr.bf16.mxu0 %v910_v3  ;;  %914 = vmatprep.subr.bf16.mxu1 %v910_v3  ;;  %v488_v16 = vadd.f32 %v480_v13, %v472_v12  ;;  %v496_v17 = vld [vmem:[%s1606_s18 + $0x8] sm:$0xff]  ;;  %v497_v28 = vld [vmem:[%s1606_s18 + $0x10] sm:$0xff]  ;;  %v489_v31 = vadd.f32 %v481_v27, %v473_v26  ;;  %p1162_p13 = scmp.ne.s32.totalorder %s1657_s28, %s1161_s7  ;;  %p1767_p5 = scmp.ne.s32.totalorder %s1744_s29, 0 }
  0xbb   : > { %v475_v7 = vld [vmem:[%s1591_s11 + $0x20] sm:$0xff]  ;;  %913 = vmatpush3.bf16.xpose.msra.mxu0 %v910_v3  ;;  %915 = vmatpush3.bf16.xpose.msra.mxu1 %v910_v3  ;;  %v476_v18 = vld [vmem:[%s1591_s11 + $0x28] sm:$0xff]  ;;  %v477_v32 = vld [vmem:[%s1591_s11 + $0x30] sm:$0xff]  ;;  %s1265_s12 = smov [#allocation11]  }
  0xbc   : > { %v483_v8 = vld [vmem:[%s1599_s16 + $0x20] sm:$0xff]  ;;  %v503_v14 = vadd.f32 %v495_v5, %v487_v6  ;;  %v512_v20 = vld [vmem:[%s1609_s14 + $0x8] sm:$0xff]  ;;  %v504_v24 = vadd.f32 %v496_v17, %v488_v16  ;;  %v485_v33 = vld [vmem:[%s1599_s16 + $0x30] sm:$0xff]  ;;  %v505_v40 = vadd.f32 %v497_v28, %v489_v31  ;;  %p1163_p11 = pnand %p1162_p13, %p1767_p5  ;;  %s1165_s25 = sshll.u32 %s1265_s12, 4  ;;  %s1166_s25 = int_to_ptr.vmem [resolvable:$false] %s1165_s25 }
  0xbd   : > { %v499_v9 = vld [vmem:[%s1606_s18 + $0x20] sm:$0xff]  ;;  %v491_v11 = vadd.f32 %v483_v8, %v475_v7  ;;  %v484_v21 = vld [vmem:[%s1599_s16 + $0x28] sm:$0xff]  ;;  %v513_v36 = vld [vmem:[%s1609_s14 + $0x10] sm:$0xff]  ;;  %v493_v37 = vadd.f32 %v485_v33, %v477_v32  ;;  %s1167_s1 = scalar_lea.vmem %s1166_s25, 2048  ;;  %p1168_p7 = scmp.lt.s32.totalorder %s1657_s28, %s1166_s25 }
  0xbe   : > { %v511_v10 = vld [vmem:[%s1609_s14] sm:$0xff]  ;;  %v500_v22 = vld [vmem:[%s1606_s18 + $0x28] sm:$0xff]  ;;  %v492_v25 = vadd.f32 %v484_v21, %v476_v18  ;;  %v520_v34 = vadd.f32 %v512_v20, %v504_v24  ;;  %v501_v38 = vld [vmem:[%s1606_s18 + $0x30] sm:$0xff]  ;;  %v521_v50 = vadd.f32 %v513_v36, %v505_v40  ;;  %p1164_p1 = pneg %p1163_p11  ;;  %p1169_p8 = scmp.lt.s32.totalorder %s1167_s1, %s1161_s7 }
  0xbf   : > { %v515_v15 = vld [vmem:[%s1609_s14 + $0x20] sm:$0xff]  ;;  %v507_v19 = vadd.f32 %v499_v9, %v491_v11  ;;  %v519_v23 = vadd.f32 %v511_v10, %v503_v14  ;;  %v516_v30 = vld [vmem:[%s1609_s14 + $0x28] sm:$0xff]  ;;  %v474_v39 = vld [vmem:[%s1591_s11 + $0x18] sm:$0xff]  ;;  %v509_v45 = vadd.f32 %v501_v38, %v493_v37 }
  0xc0   : > { %v508_v35 = vadd.f32 %v500_v22, %v492_v25  ;;  %v517_v41 = vld [vmem:[%s1609_s14 + $0x30] sm:$0xff]  ;;  %v482_v42 = vld [vmem:[%s1599_s16 + $0x18] sm:$0xff]  ;;  %p1170_p3 = por %p1169_p8, %p1168_p7 }
  0xc1   : > { %v523_v29 = vadd.f32 %v515_v15, %v507_v19  ;;  %898 = vmatprep.mubr.f32.mxu0 %v519_v23  ;;  %v498_v43 = vld [vmem:[%s1606_s18 + $0x18] sm:$0xff]  ;;  %v490_v46 = vadd.f32 %v482_v42, %v474_v39  ;;  %v525_v53 = vadd.f32 %v517_v41, %v509_v45 }
  0xc2   : > { %v524_v44 = vadd.f32 %v516_v30, %v508_v35  ;;  %v478_v47 = vld [vmem:[%s1591_s11 + $0x38] sm:$0xff]  ;;  %899 = vmatmul.mubr.f32.vlgmr.msra.gmra.mrb[0].mxu0 %v520_v34  ;;  %p1171_p0 = pnand %p1170_p3, %p1164_p1 }
  0xc3   : > { %904 = vmatprep.mubr.f32.mxu1 %v523_v29  ;;  %v486_v48 = vld [vmem:[%s1599_s16 + $0x38] sm:$0xff]  ;;  %v506_v54 = vadd.f32 %v498_v43, %v490_v46  ;;  %901 = vmatprep.mubr.f32.mxu0 %v521_v50 }
  0xc4   : > { %v502_v49 = vld [vmem:[%s1606_s18 + $0x38] sm:$0xff]  ;;  %v494_v52 = vadd.f32 %v486_v48, %v478_v47  ;;  %905 = vmatmul.mubr.f32.vlgmr.msra.gmra.mrb[0].mxu1 %v524_v44 }
  0xc5   : > { %v514_v51 = vld [vmem:[%s1609_s14 + $0x18] sm:$0xff]  ;;  %907 = vmatprep.mubr.f32.mxu1 %v525_v53 }
  0xc6   : > { %v518_v55 = vld [vmem:[%s1609_s14 + $0x38] sm:$0xff]  ;;  %v510_v56 = vadd.f32 %v502_v49, %v494_v52  ;;  %v522_v57 = vadd.f32 %v514_v51, %v506_v54 }
  0xc8   : > { %v526_v58 = vadd.f32 %v518_v55, %v510_v56  ;;  %902 = vmatmul.mubr.f32.gmra.mrb[2].mxu0 %v522_v57 }
  0xca   : > { %908 = vmatmul.mubr.f32.gmra.mrb[2].mxu1 %v526_v58 }
 0x195   : > { %v900_v59 = vpop.f32.mrb[0].mxu0 }
 0x196   : > { %636 = vst.msk [vmem:[%s455_s24 + $0x8] sm:$0xff] %vm634_vm0, %v900_v59  ;;  %v595_v61 = vpop.f32.mrb[1].mxu0 }
 0x197   : > { %v906_v60 = vpop.f32.mrb[0].mxu1  ;;  %635 = vst.msk [vmem:[%s455_s24] sm:$0xff] %vm634_vm0, %v595_v61 }
 0x198   : > { %640 = vst.msk [vmem:[%s455_s24 + $0x28] sm:$0xff] %vm634_vm0, %v906_v60  ;;  %v615_v62 = vpop.f32.mrb[1].mxu1 }
 0x199   : > { %639 = vst.msk [vmem:[%s455_s24 + $0x20] sm:$0xff] %vm634_vm0, %v615_v62 }
 0x19b   : > { %v903_v63 = vpop.f32.mrb[2].mxu0 }
 0x19c   : > { %638 = vst.msk [vmem:[%s455_s24 + $0x18] sm:$0xff] %vm634_vm0, %v903_v63  ;;  %v605_v1 = vpop.f32.mrb[3].mxu0 }
 0x19d   : > { %v909_v0 = vpop.f32.mrb[2].mxu1  ;;  %637 = vst.msk [vmem:[%s455_s24 + $0x10] sm:$0xff] %vm634_vm0, %v605_v1 }
 0x19e   : > { %642 = vst.msk [vmem:[%s455_s24 + $0x38] sm:$0xff] %vm634_vm0, %v909_v0  ;;  %v625_v2 = vpop.f32.mrb[3].mxu1 }
 0x19f   : > { %641 = vst.msk [vmem:[%s455_s24 + $0x30] sm:$0xff] %vm634_vm0, %v625_v2 }
 0x1a0   : > { %1174 = shalt.err (!%p1171_p0)
}
 0x1a1   : > { %s1175_s30 = scalar_lea.hbm %s1662_s27, 1024  ;;  %s1179_s10 = scalar_lea.hbm %s1720_s5, 2048 }
 0x1a2   : > { %p1176_p6 = scmp.ne.s32.totalorder %s1662_s27, %s1175_s30  ;;  %p1180_p4 = scmp.lt.u32.totalorder %s1662_s27, %s1720_s5 }
 0x1a3   : > { %p1181_p9 = scmp.lt.u32.totalorder %s1179_s10, %s1175_s30  ;;  %p1183_p13 = scmp.lt.u32.totalorder %s1175_s30, %s1662_s27 }
 0x1a4   : > { %p1177_p2 = pnand %p1176_p6, %p1767_p5 }
 0x1a5   : > { %p1182_p10 = por %p1181_p9, %p1180_p4 }
 0x1a6   : > { %p1178_p12 = pneg %p1177_p2 }
 0x1a7   : > { %p1184_p11 = por %p1183_p13, %p1182_p10 }
 0x1a9   : > { %p1185_p1 = pnand %p1184_p11, %p1178_p12 }
 0x1ab   : > { %1188 = shalt.err (!%p1185_p1)
}
 0x1ac   : > { %s1266_s9 = smov 128   ;;  %s1267_s16 = smov 8  }
 0x1ad   : > { %928 = dma.vmem_to_hbm [thread:$0]  (%p1767_p5), %s1657_s28, 1024, %s1662_s27, %s644_s21, %s1266_s9, %s1266_s9, %s1267_s16  }
 0x1ae PF: > { %s1768_s18 = sld [smem:[#allocation17_spill]]  ;;  %s1769_s4 = sld [smem:[#allocation19_spill]] }
 0x1af   : > { %p1771_p8 = scmp.ge.s32.totalorder %s1255_s23, 2 }
 0x1b4   : > { %s676_s14 = sand.u32 1, %s1768_s18   ;;  %p1770_p7 = scmp.ne.s32.totalorder %s1769_s4, 0 }
 0x1b5   : > { %s677_s24 = scalar_lea.sflag [#allocation4], %s676_s14 }
 0x1b6   : > { %p948_p3 = pnand %p1771_p8, %p1770_p7 }
 0x1b8   : > { %1230 = dma.done.wait (!%p948_p3), %s677_s24, 1024  }
 0x1b9   : > { %1232 = vsyncadd (!%p948_p3), %s677_s24, 4294966272  ;;  %s27_s23 = sadd.s32 1, %s1255_s23   ;;  %s1772_s15 = sld [smem:[#allocation21_spill]] }
 0x1ba   : > { %p24_p0 = scmp.ge.s32.totalorder %s27_s23, 4   ;;  %s1773_s21 = sld [smem:[#allocation18_spill]] }
 0x1bb   : > { %s1774_s22 = sld [smem:[#allocation20_spill]]  ;;  %s1775_s18 = smov %s1239_s19 }
 0x1bc   : > { %s1776_s19 = smov %s1243_s20  ;;  %26 = sbr.rel (!%p24_p0) target bundleno = 13 (0xd), region = 127 }
 0x1bf   : > { %s1777_s20 = smov %s1772_s15 }
 0x1c3   :  { %682 = vsyncpa [#allocation3], 1 }
 0x1c4   :  { %684 = vsyncpa [#allocation3 + $0x1], 1 }
 0x1c5   :  { %685 = vsyncpa [#allocation6], 1 }
 0x1c6   :  { %687 = vsyncpa [#allocation6 + $0x1], 1 }
 0x1c7   :  { %688 = vsyncpa [#allocation9], 1 }
 0x1c8   :  { %690 = vsyncpa [#allocation9 + $0x1], 1 }
 0x1c9   :  { %691 = vsyncpa [#allocation4], 1 }
 0x1ca   :  { %693 = vsyncpa [#allocation4 + $0x1], 1 }

</bundles_post_ra>
